<compile_context>
chip_gen: v7x
topology: tpu7x:2x2x1
jax: 0.10.0
libtpu: 0.0.40
codegen_flags: <defaults>
</compile_context>

<pallas_src>
import jax
import jax.numpy as jnp
import numpy as np
from jax.experimental import pallas as pl
from jax.experimental.pallas import tpu as pltpu


def _transition_kernel(x_ref, scale_ref, shift_ref, wt_ref, pwt_ref, o_ref, acc_ref):
    # x_ref:     (1, Cin, 8*KB, W) f32   KB pooling bands of one image (NCHW layout)
    # scale_ref: (Cin, 1, 1) f32         folded BN scale = gamma / sqrt(var + eps)
    # shift_ref: (Cin, 1, 1) f32         folded BN shift = beta - mean * scale
    # wt_ref:    (Cin, Cout) bf16        1x1 conv weight^T with the 1/64 pool factor folded in
    # pwt_ref:   (Wo_pad, W) bf16        column-pooling matrix (rows >= Wo are all-zero pad)
    # o_ref:     (1, KB*Wo_pad, Cout) f32
    # acc_ref:   (KB*Wo_pad, Cin) f32    VMEM scratch holding pooled activations (spatial, Cin)
    kb = x_ref.shape[2] // 8
    wo_pad = pwt_ref.shape[0]

    # Hoist the tiny operand loads out of the band loop (review: no repeated re-reads).
    s = scale_ref[...]                                          # (Cin, 1, 1)
    b = shift_ref[...]                                          # (Cin, 1, 1)
    pwt = pwt_ref[...]                                          # (Wo_pad, W) bf16

    def band_body(p, carry):
        row0 = pl.multiple_of(p * 8, 8)
        band = x_ref[0, :, pl.ds(row0, 8), :]                   # (Cin, 8, W)
        # BN + ReLU on the whole band in native layout (f32, VPU), then collapse the
        # 8 pooling rows with one sublane reduce (XLU slot is otherwise idle).
        y = jnp.maximum(band * s + b, 0.0)                      # (Cin, 8, W)
        rowsum = jnp.sum(y, axis=1)                             # (Cin, W)
        # Column pooling + transpose in one small bf16 MXU op: (Wo_pad, W) x (Cin, W)^T.
        pooled_t = jax.lax.dot_general(
            pwt, rowsum.astype(jnp.bfloat16),
            dimension_numbers=(((1,), (1,)), ((), ())),
            preferred_element_type=jnp.float32)                 # (Wo_pad, Cin)
        # Aligned (multiple-of-8) full-row store into the scratch slab for band p.
        acc_ref[pl.ds(pl.multiple_of(p * wo_pad, 8), wo_pad), :] = pooled_t
        return carry

    jax.lax.fori_loop(0, kb, band_body, 0, unroll=True)

    # Single 1x1-conv matmul for all KB bands of this step (bf16 operands, f32 accumulate).
    # Cout sits on lanes, so the store below is one unmasked, lane-dense block.
    out = jnp.dot(acc_ref[...].astype(jnp.bfloat16), wt_ref[...],
                  preferred_element_type=jnp.float32)           # (KB*Wo_pad, Cout)
    o_ref[0] = out


def _pick_band_chunk(n_ch, width, ho, vmem_budget_bytes=12 * 1024 * 1024):
    """Largest divisor of Ho whose double-buffered input chunk fits the VMEM budget."""
    band_bytes = n_ch * 8 * width * 4
    max_kb = max(1, vmem_budget_bytes // (2 * band_bytes))
    kb = 1
    for d in range(1, ho + 1):
        if ho % d == 0 and d <= max_kb:
            kb = d
    return kb


@jax.jit
def transition_block_forward(x_nchw, conv_w, gamma, beta, eps=1e-5):
    """x_nchw: (N, Cin, H, W) float32; conv_w: (Cout, Cin, 1, 1) float32."""
    N, Cin, H, W = x_nchw.shape
    Cout = conv_w.shape[0]
    assert H % 8 == 0 and W % 8 == 0
    Ho, Wo = H // 8, W // 8
    Wo_pad = ((Wo + 7) // 8) * 8
    kb = _pick_band_chunk(Cin, W, Ho)

    xf = x_nchw.astype(jnp.float32)

    # --- training-mode batch statistics: one fused pass over x (sum & sum-of-squares of a
    # per-channel-shifted copy -> numerically safe even when channel means are large) ---
    x0 = xf[:1, :, :1, :1]                                             # (1, Cin, 1, 1)
    xs = xf - x0
    mean_s = jnp.mean(xs, axis=(0, 2, 3))                              # (Cin,)
    msq_s = jnp.mean(jnp.square(xs), axis=(0, 2, 3))                   # (Cin,)
    var = jnp.maximum(msq_s - jnp.square(mean_s), 0.0)                 # biased variance
    mean = mean_s + x0[0, :, 0, 0]

    scale_c = gamma.astype(jnp.float32) / jnp.sqrt(var + eps)          # (Cin,)
    shift_c = beta.astype(jnp.float32) - mean * scale_c                # (Cin,)
    scale = scale_c.reshape(Cin, 1, 1)
    shift = shift_c.reshape(Cin, 1, 1)

    # 1x1 conv weight, transposed to (Cin, Cout), with the 1/64 average-pool factor folded
    # in (exact: power of two), cast to bf16 for a single-pass MXU matmul.
    wt = (conv_w.reshape(Cout, Cin).astype(jnp.float32).T * (1.0 / 64.0)).astype(jnp.bfloat16)

    # Column-pooling matrix (Wo_pad, W): row v selects the 8 input columns of window v;
    # padded rows (v >= Wo) are all zero so the padded output rows are exactly zero.
    pwt = (jnp.arange(W)[None, :] // 8 == jnp.arange(Wo_pad)[:, None]).astype(jnp.bfloat16)

    out_padded = pl.pallas_call(
        _transition_kernel,
        out_shape=jax.ShapeDtypeStruct((N, Ho * Wo_pad, Cout), jnp.float32),
        grid_spec=pltpu.PrefetchScalarGridSpec(
            num_scalar_prefetch=0,
            grid=(N, Ho // kb),
            in_specs=[
                pl.BlockSpec((1, Cin, 8 * kb, W), lambda n, t: (n, 0, t, 0)),
                pl.BlockSpec((Cin, 1, 1), lambda n, t: (0, 0, 0)),
                pl.BlockSpec((Cin, 1, 1), lambda n, t: (0, 0, 0)),
                pl.BlockSpec((Cin, Cout), lambda n, t: (0, 0)),
                pl.BlockSpec((Wo_pad, W), lambda n, t: (0, 0)),
            ],
            out_specs=pl.BlockSpec((1, kb * Wo_pad, Cout), lambda n, t: (n, t, 0)),
            scratch_shapes=[pltpu.VMEM((kb * Wo_pad, Cin), jnp.float32)],
        ),
        compiler_params=pltpu.CompilerParams(
            dimension_semantics=("parallel", "parallel"),
        ),
    )(xf, scale, shift, wt, pwt)

    # Drop the Wo padding and return to NCHW; this tensor is >=16x smaller than x.
    out = out_padded.reshape(N, Ho, Wo_pad, Cout)[:, :, :Wo, :]
    return jnp.transpose(out, (0, 3, 1, 2))                            # (N, Cout, Ho, Wo)


def _reference(x_nchw, conv_w, gamma, beta, eps=1e-5):
    # Pure-JAX f32 reference matching the PyTorch training-mode forward.
    mean = jnp.mean(x_nchw, axis=(0, 2, 3), keepdims=True)
    var = jnp.mean(jnp.square(x_nchw - mean), axis=(0, 2, 3), keepdims=True)
    xn = (x_nchw - mean) / jnp.sqrt(var + eps)
    xn = xn * gamma.reshape(1, -1, 1, 1) + beta.reshape(1, -1, 1, 1)
    xr = jnp.maximum(xn, 0.0)
    y = jnp.einsum("nchw,oc->nohw", xr, conv_w.reshape(conv_w.shape[0], -1))
    N, Co, H, W = y.shape
    y = y.reshape(N, Co, H // 8, 8, W // 8, 8).mean(axis=(3, 5))
    return y


if __name__ == "__main__":
    key = jax.random.PRNGKey(0)
    k_x, k_w, k_g, k_b = jax.random.split(key, 4)

    N, Cin, Cout, H, W = 2, 4, 8, 16, 16
    x = jax.random.normal(k_x, (N, Cin, H, W), dtype=jnp.float32)
    conv_w = jax.random.normal(k_w, (Cout, Cin, 1, 1), dtype=jnp.float32) * 0.1
    gamma = 1.0 + 0.1 * jax.random.normal(k_g, (Cin,), dtype=jnp.float32)
    beta = 0.1 * jax.random.normal(k_b, (Cin,), dtype=jnp.float32)

    out = transition_block_forward(x, conv_w, gamma, beta)
    out = jax.block_until_ready(out)

    ref = _reference(x, conv_w, gamma, beta)
    # bf16 pooling/conv matmul operands (f32 accumulation) vs. pure-f32 reference.
    np.testing.assert_allclose(np.asarray(out), np.asarray(ref), rtol=2e-2, atol=1e-2)
    assert out.shape == (N, Cout, H // 8, W // 8)
    print("KERNEL_OK")
</pallas_src>

<mosaic_0001>
module attributes {stable_mosaic.version = 11 : i64} {
  func.func @_transition_kernel(%arg0: i32, %arg1: i32, %arg2: memref<1x4x16x16xf32, #tpu.memory_space<vmem>>, %arg3: memref<4x1x1xf32, #tpu.memory_space<vmem>>, %arg4: memref<4x1x1xf32, #tpu.memory_space<vmem>>, %arg5: memref<4x8xbf16, #tpu.memory_space<vmem>>, %arg6: memref<8x16xbf16, #tpu.memory_space<vmem>>, %arg7: memref<1x16x8xf32, #tpu.memory_space<vmem>>, %arg8: memref<16x4xf32, #tpu.memory_space<vmem>>) attributes {dimension_semantics = [#tpu.dimension_semantics<parallel>, #tpu.dimension_semantics<parallel>], iteration_bounds = array<i64: 2, 1>, scalar_prefetch = 0 : i64, scratch_operands = 1 : i64, tpu.core_type = #tpu.core_type<tc>, window_params = [{transform_indices = @transform_0, window_bounds = array<i64: 1, 4, 16, 16>}, {pipeline_mode = #tpu.pipeline_mode<synchronous>, transform_indices = @transform_1, window_bounds = array<i64: 4, 1, 1>}, {pipeline_mode = #tpu.pipeline_mode<synchronous>, transform_indices = @transform_2, window_bounds = array<i64: 4, 1, 1>}, {pipeline_mode = #tpu.pipeline_mode<synchronous>, transform_indices = @transform_3, window_bounds = array<i64: 4, 8>}, {pipeline_mode = #tpu.pipeline_mode<synchronous>, transform_indices = @transform_4, window_bounds = array<i64: 8, 16>}, {transform_indices = @transform_5, window_bounds = array<i64: 1, 16, 8>}]} {
    %c0 = arith.constant 0 : index
    %c0_0 = arith.constant 0 : index
    %c0_1 = arith.constant 0 : index
    %0 = vector.load %arg3[%c0, %c0_0, %c0_1] : memref<4x1x1xf32, #tpu.memory_space<vmem>>, vector<4x1x1xf32>
    %c0_2 = arith.constant 0 : index
    %c0_3 = arith.constant 0 : index
    %c0_4 = arith.constant 0 : index
    %1 = vector.load %arg4[%c0_2, %c0_3, %c0_4] : memref<4x1x1xf32, #tpu.memory_space<vmem>>, vector<4x1x1xf32>
    %c0_5 = arith.constant 0 : index
    %c0_6 = arith.constant 0 : index
    %2 = vector.load %arg6[%c0_5, %c0_6] : memref<8x16xbf16, #tpu.memory_space<vmem>>, vector<8x16xbf16>
    %c0_i32 = arith.constant 0 : i32
    %c8_i32 = arith.constant 8 : i32
    %3 = arith.muli %c0_i32, %c8_i32 : i32
    %4 = tpu.assume_multiple %3, 8 : i32
    %c0_7 = arith.constant 0 : index
    %c0_8 = arith.constant 0 : index
    %5 = arith.index_cast %4 : i32 to index
    %c0_9 = arith.constant 0 : index
    %6 = vector.load %arg2[%c0_7, %c0_8, %5, %c0_9] : memref<1x4x16x16xf32, #tpu.memory_space<vmem>>, vector<1x4x8x16xf32>
    %7 = vector.shape_cast %6 : vector<1x4x8x16xf32> to vector<4x8x16xf32>
    %8 = vector.broadcast %0 : vector<4x1x1xf32> to vector<4x8x16xf32>
    %9 = arith.mulf %7, %8 : vector<4x8x16xf32>
    %10 = vector.broadcast %1 : vector<4x1x1xf32> to vector<4x8x16xf32>
    %11 = arith.addf %9, %10 : vector<4x8x16xf32>
    %cst = arith.constant 0.000000e+00 : f32
    %12 = vector.broadcast %cst : f32 to vector<4x8x16xf32>
    %13 = arith.maximumf %11, %12 : vector<4x8x16xf32>
    %cst_10 = arith.constant dense<0.000000e+00> : vector<4x16xf32>
    %14 = vector.multi_reduction <add>, %13, %cst_10 [1] : vector<4x8x16xf32> to vector<4x16xf32>
    %15 = arith.truncf %14 : vector<4x16xf32> to vector<4x16xbf16>
    %cst_11 = arith.constant dense<0.000000e+00> : vector<8x4xf32>
    %16 = tpu.matmul %2, %15, %cst_11 {dimension_numbers = #tpu.dot_dimension_numbers<[1], [1], [0], [0], [0, 0, 1, 0], [], []>} : vector<8x16xbf16>, vector<4x16xbf16>, vector<8x4xf32> -> vector<8x4xf32>
    %c8_i32_12 = arith.constant 8 : i32
    %17 = arith.muli %c0_i32, %c8_i32_12 : i32
    %18 = tpu.assume_multiple %17, 8 : i32
    %19 = arith.index_cast %18 : i32 to index
    %c0_13 = arith.constant 0 : index
    %20 = vector.load %arg8[%19, %c0_13] : memref<16x4xf32, #tpu.memory_space<vmem>>, vector<8x4xf32>
    tpu.vector_store %arg8[%19, %c0_13], %16 {strides = array<i32>} : memref<16x4xf32, #tpu.memory_space<vmem>>, vector<8x4xf32>,
    %c1_i32 = arith.constant 1 : i32
    %c8_i32_14 = arith.constant 8 : i32
    %21 = arith.muli %c1_i32, %c8_i32_14 : i32
    %22 = tpu.assume_multiple %21, 8 : i32
    %c0_15 = arith.constant 0 : index
    %c0_16 = arith.constant 0 : index
    %23 = arith.index_cast %22 : i32 to index
    %c0_17 = arith.constant 0 : index
    %24 = vector.load %arg2[%c0_15, %c0_16, %23, %c0_17] : memref<1x4x16x16xf32, #tpu.memory_space<vmem>>, vector<1x4x8x16xf32>
    %25 = vector.shape_cast %24 : vector<1x4x8x16xf32> to vector<4x8x16xf32>
    %26 = vector.broadcast %0 : vector<4x1x1xf32> to vector<4x8x16xf32>
    %27 = arith.mulf %25, %26 : vector<4x8x16xf32>
    %28 = vector.broadcast %1 : vector<4x1x1xf32> to vector<4x8x16xf32>
    %29 = arith.addf %27, %28 : vector<4x8x16xf32>
    %cst_18 = arith.constant 0.000000e+00 : f32
    %30 = vector.broadcast %cst_18 : f32 to vector<4x8x16xf32>
    %31 = arith.maximumf %29, %30 : vector<4x8x16xf32>
    %cst_19 = arith.constant dense<0.000000e+00> : vector<4x16xf32>
    %32 = vector.multi_reduction <add>, %31, %cst_19 [1] : vector<4x8x16xf32> to vector<4x16xf32>
    %33 = arith.truncf %32 : vector<4x16xf32> to vector<4x16xbf16>
    %cst_20 = arith.constant dense<0.000000e+00> : vector<8x4xf32>
    %34 = tpu.matmul %2, %33, %cst_20 {dimension_numbers = #tpu.dot_dimension_numbers<[1], [1], [0], [0], [0, 0, 1, 0], [], []>} : vector<8x16xbf16>, vector<4x16xbf16>, vector<8x4xf32> -> vector<8x4xf32>
    %c8_i32_21 = arith.constant 8 : i32
    %35 = arith.muli %c1_i32, %c8_i32_21 : i32
    %36 = tpu.assume_multiple %35, 8 : i32
    %37 = arith.index_cast %36 : i32 to index
    %c0_22 = arith.constant 0 : index
    %38 = vector.load %arg8[%37, %c0_22] : memref<16x4xf32, #tpu.memory_space<vmem>>, vector<8x4xf32>
    tpu.vector_store %arg8[%37, %c0_22], %34 {strides = array<i32>} : memref<16x4xf32, #tpu.memory_space<vmem>>, vector<8x4xf32>,
    %c2_i32 = arith.constant 2 : i32
    %c0_23 = arith.constant 0 : index
    %c0_24 = arith.constant 0 : index
    %39 = vector.load %arg8[%c0_23, %c0_24] : memref<16x4xf32, #tpu.memory_space<vmem>>, vector<16x4xf32>
    %40 = arith.truncf %39 : vector<16x4xf32> to vector<16x4xbf16>
    %c0_25 = arith.constant 0 : index
    %c0_26 = arith.constant 0 : index
    %41 = vector.load %arg5[%c0_25, %c0_26] : memref<4x8xbf16, #tpu.memory_space<vmem>>, vector<4x8xbf16>
    %cst_27 = arith.constant dense<0.000000e+00> : vector<16x8xf32>
    %42 = tpu.matmul %40, %41, %cst_27 {dimension_numbers = #tpu.dot_dimension_numbers<[1], [0], [0], [1], [0, 0, 1, 1], [], []>} : vector<16x4xbf16>, vector<4x8xbf16>, vector<16x8xf32> -> vector<16x8xf32>
    %c0_28 = arith.constant 0 : index
    %c0_29 = arith.constant 0 : index
    %c0_30 = arith.constant 0 : index
    %43 = vector.load %arg7[%c0_28, %c0_29, %c0_30] : memref<1x16x8xf32, #tpu.memory_space<vmem>>, vector<1x16x8xf32>
    %44 = vector.shape_cast %43 : vector<1x16x8xf32> to vector<16x8xf32>
    %45 = vector.shape_cast %42 : vector<16x8xf32> to vector<1x16x8xf32>
    tpu.vector_store %arg7[%c0_28, %c0_29, %c0_30], %45 {strides = array<i32>} : memref<1x16x8xf32, #tpu.memory_space<vmem>>, vector<1x16x8xf32>,
    return
  }
  func.func @transform_0(%arg0: i32, %arg1: i32) -> (i32, i32, i32, i32) {
    %c0_i32 = arith.constant 0 : i32
    %c0_i32_0 = arith.constant 0 : i32
    %c0_i32_1 = arith.constant 0 : i32
    return %arg0, %c0_i32, %arg1, %c0_i32_0 : i32, i32, i32, i32
  }
  func.func @transform_1(%arg0: i32, %arg1: i32) -> (i32, i32, i32) {
    %c0_i32 = arith.constant 0 : i32
    %c0_i32_0 = arith.constant 0 : i32
    %c0_i32_1 = arith.constant 0 : i32
    %c0_i32_2 = arith.constant 0 : i32
    return %c0_i32, %c0_i32_0, %c0_i32_1 : i32, i32, i32
  }
  func.func @transform_2(%arg0: i32, %arg1: i32) -> (i32, i32, i32) {
    %c0_i32 = arith.constant 0 : i32
    %c0_i32_0 = arith.constant 0 : i32
    %c0_i32_1 = arith.constant 0 : i32
    %c0_i32_2 = arith.constant 0 : i32
    return %c0_i32, %c0_i32_0, %c0_i32_1 : i32, i32, i32
  }
  func.func @transform_3(%arg0: i32, %arg1: i32) -> (i32, i32) {
    %c0_i32 = arith.constant 0 : i32
    %c0_i32_0 = arith.constant 0 : i32
    %c0_i32_1 = arith.constant 0 : i32
    return %c0_i32, %c0_i32_0 : i32, i32
  }
  func.func @transform_4(%arg0: i32, %arg1: i32) -> (i32, i32) {
    %c0_i32 = arith.constant 0 : i32
    %c0_i32_0 = arith.constant 0 : i32
    %c0_i32_1 = arith.constant 0 : i32
    return %c0_i32, %c0_i32_0 : i32, i32
  }
  func.func @transform_5(%arg0: i32, %arg1: i32) -> (i32, i32, i32) {
    %c0_i32 = arith.constant 0 : i32
    %c0_i32_0 = arith.constant 0 : i32
    return %arg0, %arg1, %c0_i32 : i32, i32, i32
  }
}

</mosaic_0001>

<bundles_post_ra>
// kernel: transition_block_forward.1
= control target key start
LH: loop header
LB: loop body
LE: loop exit
PB: predicated region body
PF: predicated region fallthrough
CT: control target
= control target key end

     0   :  { %s844_s18 = smov 0   ;;  %s846_s19 = smov 0   ;;  %s938_s0 = inlined_call_operand.vmem [shape: f32[2,4,16,16], index: 0, kind: input, shape index: {}]   ;;  %s939_s1 = inlined_call_operand.vmem [shape: f32[4,1,1], index: 1, kind: input, shape index: {}]   ;;  %s940_s2 = inlined_call_operand.vmem [shape: f32[4,1,1], index: 2, kind: input, shape index: {}]   ;;  %s941_s3 = inlined_call_operand.vmem [shape: bf16[4,8], index: 3, kind: input, shape index: {}]   ;;  %s942_s4 = inlined_call_operand.vmem [shape: bf16[8,16], index: 4, kind: input, shape index: {}]   ;;  %s943_s5 = inlined_call_operand.vmem [shape: f32[2,16,8], index: 5, kind: output, shape index: {}]  }
   0x1   :  { %s848_s20 = smov 0  }
   0x2 LB: > { %s27_s21 = sadd.s32 1, %s805_s19  ;;  %p710_p0 = scmp.ge.s32.totalorder %s809_s20, 1  ;;  %s809_s20 = sphi %s848_s20, %s15_s20   ;;  %s805_s19 = sphi %s846_s19, %s945_s19   ;;  %s801_s18 = sphi %s844_s18, %s944_s18  }
   0x3   : > { %p29_p1 = scmp.ge.s32.totalorder %s27_s21, 2  ;;  %p208_p2 = scmp.lt.s32.totalorder %s809_s20, 3 }
   0x5   : > { %s947_s21 = smov (%p29_p1, %s27_s21), 0  ;;  %p209_p3 = pnand %p710_p0, %p208_p2 }
   0x6   : > { %v717_v0 = vld [vmem:[%s939_s1 + $0x2] ss:$0 sm:$0xff] (!%p209_p3)  ;;  %v715_v1 = vld [vmem:[%s939_s1] ss:$0 sm:$0xff] (!%p209_p3)  ;;  %v811_v2 = vmov (!%p209_p3), 0   ;;  %v812_v9 = vmov (!%p209_p3), 0.0  }
   0x7   : > { %212 = sbr.rel (%p209_p3) target bundleno = 621 (0x26d), region = 40  ;;  %786 = vset.pattern.permute.xlu1 (!%p209_p3), %v811_v2  ;;  %785 = vset.pattern.permute.xlu0 (!%p209_p3), %v811_v2  ;;  %v718_v3 = vld [vmem:[%s939_s1 + $0x3] ss:$0 sm:$0xff] (!%p209_p3)  ;;  %v716_v4 = vld [vmem:[%s939_s1 + $0x1] ss:$0 sm:$0xff] (!%p209_p3)  ;;  %vm813_vm0 = vmmov (!%p209_p3), 0  }
   0x8   : > { %307 = vperm.xlu1 (!%p209_p3), %786, %v717_v0   ;;  %299 = vperm.xlu0 (!%p209_p3), %785, %v715_v1   ;;  %v720_v5 = vld [vmem:[%s940_s2 + $0x1] ss:$0 sm:$0xff] (!%p209_p3)  ;;  %v719_v6 = vld [vmem:[%s940_s2] ss:$0 sm:$0xff] (!%p209_p3)  ;;  %v722_v7 = vld [vmem:[%s940_s2 + $0x3] ss:$0 sm:$0xff] (!%p209_p3) }
   0x9   : > { %v721_v8 = vld [vmem:[%s940_s2 + $0x2] ss:$0 sm:$0xff] (!%p209_p3)  ;;  %740 = vmatprep.subr.bf16.mxu0 (!%p209_p3), %v812_v9  ;;  %746 = vmatprep.subr.bf16.mxu1 (!%p209_p3), %v812_v9  ;;  %p245_p4 = scmp.lt.s32.totalorder (!%p209_p3), %s801_s18, 1  ;;  %vm362_vm1 = vcmask (!%p209_p3), 130048   ;;  %vm403_vm2 = vcmask (!%p209_p3), 1041409   ;;  %vm405_vm3 = vcmask (!%p209_p3), 1042434  }
   0xa   : > { %742 = vmatprep.mubr.msk.bf16.mxu0 (!%p209_p3), %vm813_vm0, %v812_v9  ;;  %748 = vmatprep.mubr.msk.bf16.mxu1 (!%p209_p3), %vm813_vm0, %v812_v9  ;;  %vm407_vm4 = vcmask (!%p209_p3), 1043459   ;;  %vm571_vm5 = vcmask (!%p209_p3), 1041408   ;;  %vm456_vm6 = vcmask (!%p209_p3), 31744   ;;  %vm616_vm7 = vcmask (!%p209_p3), 64512  }
   0xc   : > { %311 = vperm.xlu1 (!%p209_p3), %786, %v718_v3   ;;  %303 = vperm.xlu0 (!%p209_p3), %785, %v716_v4  }
   0xe   : > { %s949_s18 = smov (!%p245_p4, %s801_s18), 1 }
   0xf   : > { %s732_s13 = sshll.u32 %s949_s18, 6  ;;  %s733_s25 = sshll.u32 %s949_s18, 4 }
  0x10   : > { %343 = vperm.xlu1 %786, %v720_v5   ;;  %339 = vperm.xlu0 %785, %v719_v6   ;;  %s252_s16 = scalar_lea.vmem %s938_s0, %s732_s13  ;;  %s262_s28 = scalar_lea.vmem %s943_s5, %s733_s25 }
  0x11   : > { %v274_v12 = vld [vmem:[%s252_s16] sm:$0xff]  ;;  %v724_v13 = vld [vmem:[%s252_s16 + $0x8] sm:$0xff]  ;;  %v275_v16 = vld [vmem:[%s252_s16 + $0x10] sm:$0xff] }
  0x12   : > { %v725_v17 = vld [vmem:[%s252_s16 + $0x18] sm:$0xff]  ;;  %v276_v22 = vld [vmem:[%s252_s16 + $0x20] sm:$0xff]  ;;  %v726_v25 = vld [vmem:[%s252_s16 + $0x28] sm:$0xff] }
  0x13   : > { %v277_v26 = vld [vmem:[%s252_s16 + $0x30] sm:$0xff]  ;;  %v727_v27 = vld [vmem:[%s252_s16 + $0x38] sm:$0xff] }
  0x14   : > { %351 = vperm.xlu1 %786, %v722_v7   ;;  %347 = vperm.xlu0 %785, %v721_v8  }
  0x87   : > { %v308_v10 = vpop.permute.xlu1 %307  ;;  %v300_v11 = vpop.permute.xlu0 %299 }
  0x88   : > { %v314_v18 = vmul.f32 %v300_v11, %v274_v12  ;;  %v463_v19 = vmul.f32 %v724_v13, %v300_v11  ;;  %v316_v36 = vmul.f32 %v308_v10, %v276_v22  ;;  %v465_v37 = vmul.f32 %v726_v25, %v308_v10 }
  0x8b   : > { %v312_v14 = vpop.permute.xlu1 %311  ;;  %v304_v15 = vpop.permute.xlu0 %303 }
  0x8c   : > { %v315_v20 = vmul.f32 %v304_v15, %v275_v16  ;;  %v464_v21 = vmul.f32 %v725_v17, %v304_v15  ;;  %v317_v38 = vmul.f32 %v312_v14, %v277_v26  ;;  %v466_v39 = vmul.f32 %v727_v27, %v312_v14 }
  0x8f   : > { %v344_v23 = vpop.permute.xlu1 %343  ;;  %v340_v24 = vpop.permute.xlu0 %339 }
  0x90   : > { %v355_v28 = vadd.f32 %v344_v23, %v315_v20  ;;  %v468_v29 = vadd.f32 %v464_v21, %v344_v23  ;;  %v354_v30 = vadd.f32 %v340_v24, %v314_v18  ;;  %v467_v31 = vadd.f32 %v463_v19, %v340_v24 }
  0x92   : > { %v359_v32 = vmax.f32 %v355_v28, 0.0  ;;  %v472_v33 = vmax.f32 %v468_v29, 0.0  ;;  %v358_v34 = vmax.f32 %v354_v30, 0.0  ;;  %v471_v35 = vmax.f32 %v467_v31, 0.0 }
  0x93   : > { %v352_v40 = vpop.permute.xlu1 %351  ;;  %v348_v41 = vpop.permute.xlu0 %347 }
  0x94   : > { %v370_v42 = vsel %vm362_vm1, %v359_v32, 0.0  ;;  %v482_v43 = vsel %vm362_vm1, %v472_v33, 0.0  ;;  %v363_v44 = vsel %vm362_vm1, %v358_v34, 0.0  ;;  %v475_v45 = vsel %vm362_vm1, %v471_v35, 0.0 }
  0x95   : > { %v371_v46 = vrot.slane %v370_v42, 4  ;;  %v483_v47 = vrot.slane %v482_v43, 4  ;;  %v364_v48 = vrot.slane %v363_v44, 4  ;;  %v476_v49 = vrot.slane %v475_v45, 4 }
  0x96   : > { %v357_v50 = vadd.f32 %v352_v40, %v317_v38  ;;  %v470_v51 = vadd.f32 %v466_v39, %v352_v40  ;;  %v356_v52 = vadd.f32 %v348_v41, %v316_v36  ;;  %v469_v53 = vadd.f32 %v465_v37, %v348_v41 }
  0x97   : > { %v372_v54 = vadd.f32 %v371_v46, %v370_v42  ;;  %v484_v55 = vadd.f32 %v483_v47, %v482_v43  ;;  %v365_v56 = vadd.f32 %v364_v48, %v363_v44  ;;  %v477_v57 = vadd.f32 %v476_v49, %v475_v45 }
  0x98   : > { %v361_v58 = vmax.f32 %v357_v50, 0.0  ;;  %v474_v59 = vmax.f32 %v470_v51, 0.0  ;;  %v360_v60 = vmax.f32 %v356_v52, 0.0  ;;  %v473_v61 = vmax.f32 %v469_v53, 0.0 }
  0x99   : > { %v373_v62 = vrot.slane %v372_v54, 2  ;;  %v485_v63 = vrot.slane %v484_v55, 2  ;;  %v366_v0 = vrot.slane %v365_v56, 2  ;;  %v478_v1 = vrot.slane %v477_v57, 2 }
  0x9a   : > { %v384_v2 = vsel %vm362_vm1, %v361_v58, 0.0  ;;  %v496_v3 = vsel %vm362_vm1, %v474_v59, 0.0  ;;  %v377_v4 = vsel %vm362_vm1, %v360_v60, 0.0  ;;  %v489_v5 = vsel %vm362_vm1, %v473_v61, 0.0 }
  0x9b   : > { %v374_v6 = vadd.f32 %v373_v62, %v372_v54  ;;  %v486_v7 = vadd.f32 %v485_v63, %v484_v55  ;;  %v367_v8 = vadd.f32 %v366_v0, %v365_v56  ;;  %v479_v10 = vadd.f32 %v478_v1, %v477_v57 }
  0x9c   : > { %v385_v11 = vrot.slane %v384_v2, 4  ;;  %v497_v12 = vrot.slane %v496_v3, 4  ;;  %v378_v13 = vrot.slane %v377_v4, 4  ;;  %v490_v14 = vrot.slane %v489_v5, 4 }
  0x9d   : > { %v375_v15 = vrot.slane %v374_v6, 1  ;;  %v487_v16 = vrot.slane %v486_v7, 1  ;;  %v368_v17 = vrot.slane %v367_v8, 1  ;;  %v480_v18 = vrot.slane %v479_v10, 1 }
  0x9e   : > { %v386_v19 = vadd.f32 %v385_v11, %v384_v2  ;;  %v498_v20 = vadd.f32 %v497_v12, %v496_v3  ;;  %v379_v21 = vadd.f32 %v378_v13, %v377_v4  ;;  %v491_v22 = vadd.f32 %v490_v14, %v489_v5  ;;  %v273_v5 = vld [vmem:[%s942_s4] sm:$0xf] }
  0x9f   : > { %v376_v23 = vadd.f32 %v375_v15, %v374_v6  ;;  %v488_v24 = vadd.f32 %v487_v16, %v486_v7  ;;  %v369_v25 = vadd.f32 %v368_v17, %v367_v8  ;;  %v481_v26 = vadd.f32 %v480_v18, %v479_v10  ;;  %v567_v6 = vld [vmem:[%s941_s3] sm:$0x3] }
  0xa0   : > { %v387_v27 = vrot.slane %v386_v19, 2  ;;  %v499_v28 = vrot.slane %v498_v20, 2  ;;  %v380_v29 = vrot.slane %v379_v21, 2  ;;  %v492_v30 = vrot.slane %v491_v22, 2 }
  0xa1   : > { %v392_v35 = vpack.c.bf16 %v376_v23, %v376_v23  ;;  %v504_v36 = vpack.c.bf16 %v488_v24, %v488_v24  ;;  %v391_v37 = vpack.c.bf16 %v369_v25, %v369_v25  ;;  %v503_v38 = vpack.c.bf16 %v481_v26, %v481_v26 }
  0xa2   : > { %v388_v31 = vadd.f32 %v387_v27, %v386_v19  ;;  %v500_v32 = vadd.f32 %v499_v28, %v498_v20  ;;  %v381_v33 = vadd.f32 %v380_v29, %v379_v21  ;;  %v493_v34 = vadd.f32 %v492_v30, %v491_v22 }
  0xa3   : > { %v400_v47 = vunpack.c.l.b16 %v392_v35  ;;  %v512_v48 = vunpack.c.l.b16 %v504_v36  ;;  %v399_v49 = vunpack.c.l.b16 %v391_v37  ;;  %v511_v50 = vunpack.c.l.b16 %v503_v38 }
  0xa4   : > { %v389_v39 = vrot.slane %v388_v31, 1  ;;  %v501_v40 = vrot.slane %v500_v32, 1  ;;  %v382_v41 = vrot.slane %v381_v33, 1  ;;  %v494_v42 = vrot.slane %v493_v34, 1 }
  0xa5   : > { %v404_v59 = vsel %vm403_vm2, %v400_v47, %v399_v49  ;;  %v515_v60 = vsel %vm403_vm2, %v512_v48, %v511_v50  ;;  %v573_v7 = vsel %vm571_vm5, %v567_v6, 0 }
  0xa6   : > { %v390_v43 = vadd.f32 %v389_v39, %v388_v31  ;;  %v502_v44 = vadd.f32 %v501_v40, %v500_v32  ;;  %v383_v45 = vadd.f32 %v382_v41, %v381_v33  ;;  %v495_v46 = vadd.f32 %v494_v42, %v493_v34 }
  0xa8   : > { %v393_v51 = vpack.c.bf16 %v383_v45, %v383_v45  ;;  %v505_v52 = vpack.c.bf16 %v495_v46, %v495_v46  ;;  %v394_v53 = vpack.c.bf16 %v390_v43, %v390_v43  ;;  %v506_v54 = vpack.c.bf16 %v502_v44, %v502_v44 }
  0xaa   : > { %v401_v55 = vunpack.c.l.b16 %v393_v51  ;;  %v513_v56 = vunpack.c.l.b16 %v505_v52  ;;  %v402_v57 = vunpack.c.l.b16 %v394_v53  ;;  %v514_v58 = vunpack.c.l.b16 %v506_v54 }
  0xac   : > { %v406_v61 = vsel %vm405_vm3, %v401_v55, %v404_v59  ;;  %v516_v62 = vsel %vm405_vm3, %v513_v56, %v515_v60 }
  0xad   : > { %v408_v63 = vsel %vm407_vm4, %v402_v57, %v406_v61  ;;  %v517_v0 = vsel %vm407_vm4, %v514_v58, %v516_v62 }
  0xae   : > { %v409_v1 = vpack.c.b16 %v408_v63, %v408_v63  ;;  %v518_v2 = vpack.c.b16 %v517_v0, %v517_v0 }
  0xb0   : > { %v414_v3 = vsel %vm362_vm1, %v409_v1, 0  ;;  %v520_v4 = vsel %vm362_vm1, %v518_v2, 0 }
  0xb1   : > { %741 = vmatpush3.bf16.xpose.msra.mxu0 %v414_v3  ;;  %747 = vmatpush3.bf16.xpose.msra.mxu1 %v520_v4 }
  0xb2   : > { %752 = vmatprep.subr.bf16.mxu0 %v812_v9 }
  0xb8   : > { %743 = vmatmul.mubr.msk.bf16.vlgmr.msra.gmra.mrb[0].mxu0 %vm362_vm1, %v273_v5  ;;  %749 = vmatmul.mubr.msk.bf16.vlgmr.msra.gmra.mrb[0].mxu1 %vm362_vm1, %v273_v5 }
  0xb9   : > { %754 = vmatprep.mubr.msk.bf16.mxu0 %vm813_vm0, %v812_v9  ;;  %753 = vmatpush3.bf16.msra.mxu0 %v573_v7 }
 0x18b   : > { %v450_v8 = vpop.f32.mrb[0].mxu0  ;;  %v556_v10 = vpop.f32.mrb[0].mxu1 }
 0x18c   : > { %457 = vst.msk [vmem:[#allocation2] sm:$0xff] %vm456_vm6, %v450_v8  ;;  %563 = vst.msk [vmem:[#allocation2 + $0x8] sm:$0xff] %vm456_vm6, %v556_v10  ;;  %v744_v11 = vpop.f32.mrb[1].mxu0  ;;  %v750_v12 = vpop.f32.mrb[1].mxu1 }
 0x18d   : > { %v453_v13 = vpop.f32.mrb[2].mxu0  ;;  %v559_v14 = vpop.f32.mrb[2].mxu1 }
 0x18e   : > { %v745_v15 = vpop.f32.mrb[3].mxu0  ;;  %v751_v16 = vpop.f32.mrb[3].mxu1 }
 0x193   : > { %v564_v9 = vld [vmem:[#allocation2] sm:$0xff]  ;;  %v565_v17 = vld [vmem:[#allocation2 + $0x8] sm:$0xff] }
 0x194   : > { %v566_v18 = vpack.c.bf16 %v565_v17, %v564_v9 }
 0x196   : > { %755 = vmatmul.mubr.msk.bf16.vlgmr.msra.gmra.mrb[4].mxu0 %vm456_vm6, %v566_v18 }
 0x269   : > { %v609_v19 = vpop.f32.mrb[4].mxu0 }
 0x26a   : > { %617 = vst.msk [vmem:[%s262_s28] sm:$0xff] %vm616_vm7, %v609_v19  ;;  %v756_v20 = vpop.f32.mrb[5].mxu0 }
 0x26b   : > { %v612_v21 = vpop.f32.mrb[6].mxu0 }
 0x26c   : > { %618 = vst.msk [vmem:[%s262_s28 + $0x8] sm:$0xff] %vm616_vm7, %v612_v21  ;;  %v757_v22 = vpop.f32.mrb[7].mxu0 }
 0x26d PF: > { %s15_s20 = sadd.s32 1, %s809_s20   ;;  %s944_s18 = smov %s805_s19 }
 0x26e   : > { %p12_p5 = scmp.ge.s32.totalorder %s15_s20, 4   ;;  %s945_s19 = smov %s947_s21 }
 0x270   :  { %14 = sbr.rel (!%p12_p5) target bundleno = 2 (0x2), region = 72 }

</bundles_post_ra>
